<compile_context>
chip_gen: v5e
topology: v5e:2x2
jax: 0.10.0
libtpu: 0.0.40
codegen_flags: <defaults>
</compile_context>

<pallas_src>
import functools

import jax
import jax.numpy as jnp
from jax import lax
from jax.experimental import pallas as pl
from jax.experimental.pallas import tpu as pltpu

LANES = 128
MAX_TILE_ROWS = 8192    # (8192,128) f32 = 4 MiB per stream per pipeline buffer
CHUNK_ROWS = 512        # elementwise working-set chunk inside the kernel
PIPELINE_TILES = 3      # target tiles per shard so the pipeline can overlap


def _round_up(x, m):
    return ((x + m - 1) // m) * m


def _row_align(dtype):
    # native sublane tile is (8*packing, 128): 8 rows f32, 16 bf16, 32 int8
    return 8 * max(1, 4 // jnp.dtype(dtype).itemsize)


def _multi_tensorcore():
    # v7x exposes two TensorCores per chip; v5e/v6e have one.  A conservative
    # device-kind check keeps single-core chips on the safe 1-shard path.
    try:
        kind = jax.devices()[0].device_kind.lower()
    except Exception:
        return False
    return "v7" in kind


def _bce_ls_kernel(pred_ref, tgt_ref, part_ref, *, smoothing, rows_valid,
                   tile_rows, chunk_rows, tiles_per_shard):
    s = pl.program_id(0)            # shard (core-parallel on v7x)
    i = pl.program_id(1)            # tile within shard (reduction axis)
    base_row = (s * tiles_per_shard + i) * tile_rows

    @pl.when(i == 0)
    def _():
        part_ref[...] = jnp.zeros_like(part_ref)

    num_chunks = tile_rows // chunk_rows
    one_m_s = jnp.float32(1.0 - smoothing)
    half_s = jnp.float32(0.5 * smoothing)

    def chunk_loss(c):
        r0 = pl.multiple_of(c * chunk_rows, 8)
        x = pred_ref[pl.ds(r0, chunk_rows), :].astype(jnp.float32)
        t = tgt_ref[pl.ds(r0, chunk_rows), :].astype(jnp.float32) * one_m_s + half_s
        # numerically-stable BCE-with-logits (same formulation PyTorch uses);
        # plain log/exp keeps the lowering on vanilla EUP ops.
        return jnp.maximum(x, 0.0) - x * t + jnp.log(1.0 + jnp.exp(-jnp.abs(x)))

    def fold(l):
        # (chunk_rows,128) -> (8,128): pure elementwise vreg adds (VPU only),
        # no cross-lane XLU work until the tiny wrapper-side reduce.
        return l.reshape(chunk_rows // 8, 8, LANES).sum(axis=0)

    is_full = base_row + tile_rows <= rows_valid

    @pl.when(is_full)
    def _():
        def body(c, acc):
            return acc + fold(chunk_loss(c))
        part_ref[...] += lax.fori_loop(
            0, num_chunks, body, jnp.zeros((8, LANES), jnp.float32))

    @pl.when(jnp.logical_not(is_full))
    def _():
        # Tile straddles (or lies past) the last valid row: row-level mask.
        # jnp.where is a select, so garbage/NaN in the undefined tail of a
        # partial block cannot leak into the sum.
        def body(c, acc):
            loss = chunk_loss(c)
            row_ids = (base_row + c * chunk_rows
                       + lax.broadcasted_iota(jnp.int32, (chunk_rows, LANES), 0))
            return acc + fold(jnp.where(row_ids < rows_valid, loss, 0.0))
        part_ref[...] += lax.fori_loop(
            0, num_chunks, body, jnp.zeros((8, LANES), jnp.float32))


def label_smoothing_bce_with_logits(pred, target, smoothing=0.1):
    assert pred.shape == target.shape
    n = pred.size
    assert n > 0

    # bool targets are awkward to stream; int8 is the cheapest safe container.
    if target.dtype == jnp.bool_:
        target = target.astype(jnp.int8)

    flat_p = pred.reshape(-1)
    flat_t = target.reshape(-1)

    rows_valid = n // LANES          # full 128-lane rows handled by the kernel
    n_main = rows_valid * LANES
    rem = n - n_main

    total = jnp.float32(0.0)

    if rows_valid > 0:
        # ---- static tiling arithmetic (all Python ints) ----
        num_shards = 2 if (_multi_tensorcore()
                           and rows_valid >= 2 * CHUNK_ROWS) else 1

        align = max(_row_align(pred.dtype), _row_align(target.dtype))
        rows_per_shard = pl.cdiv(rows_valid, num_shards)
        tile_rows = min(MAX_TILE_ROWS,
                        _round_up(pl.cdiv(rows_per_shard, PIPELINE_TILES), align))
        if tile_rows > CHUNK_ROWS:
            tile_rows = _round_up(tile_rows, CHUNK_ROWS)
            chunk_rows = CHUNK_ROWS
        else:
            chunk_rows = tile_rows
        total_tiles = pl.cdiv(rows_valid, tile_rows)
        num_shards = min(num_shards, total_tiles)
        tiles_per_shard = pl.cdiv(total_tiles, num_shards)

        # ---- zero-copy lane-dense view of the 128-aligned prefix ----
        main_p = flat_p if rem == 0 else flat_p[:n_main]
        main_t = flat_t if rem == 0 else flat_t[:n_main]
        p2d = main_p.reshape(rows_valid, LANES)
        t2d = main_t.reshape(rows_valid, LANES)

        kernel = functools.partial(
            _bce_ls_kernel, smoothing=float(smoothing), rows_valid=rows_valid,
            tile_rows=tile_rows, chunk_rows=chunk_rows,
            tiles_per_shard=tiles_per_shard)

        in_spec = pl.BlockSpec((tile_rows, LANES),
                               lambda s, i: (s * tiles_per_shard + i, 0))
        out_spec = pl.BlockSpec((8, LANES), lambda s, i: (s, 0))

        itemsize = (jnp.dtype(pred.dtype).itemsize
                    + jnp.dtype(target.dtype).itemsize)
        vmem_limit = min((8 << 20) + 2 * tile_rows * LANES * itemsize, 64 << 20)

        cost = pl.CostEstimate(
            flops=8 * n_main, transcendentals=2 * n_main,
            bytes_accessed=int(p2d.nbytes + t2d.nbytes
                               + num_shards * 8 * LANES * 4))

        shard_sem = pltpu.CORE_PARALLEL if num_shards > 1 else pltpu.ARBITRARY

        partials = pl.pallas_call(
            kernel,
            out_shape=jax.ShapeDtypeStruct((num_shards * 8, LANES), jnp.float32),
            grid_spec=pltpu.PrefetchScalarGridSpec(
                num_scalar_prefetch=0,
                grid=(num_shards, tiles_per_shard),
                in_specs=[in_spec, in_spec],
                out_specs=out_spec,
            ),
            compiler_params=pltpu.CompilerParams(
                dimension_semantics=(shard_sem, pltpu.ARBITRARY),
                vmem_limit_bytes=int(vmem_limit)),
            cost_estimate=cost,
        )(p2d, t2d)

        # tiny final reduce over (num_shards*8, 128) partials
        total = total + jnp.sum(partials)

    if rem > 0:
        # <128-element remainder: plain jnp glue (negligible work).
        x = flat_p[n_main:].astype(jnp.float32)
        t = flat_t[n_main:].astype(jnp.float32) * (1.0 - smoothing) + 0.5 * smoothing
        total = total + jnp.sum(
            jnp.maximum(x, 0.0) - x * t + jnp.log1p(jnp.exp(-jnp.abs(x))))

    return total * jnp.float32(1.0 / n)


def _reference(pred, target, smoothing=0.1):
    x = pred.astype(jnp.float32)
    t = target.astype(jnp.float32) * (1.0 - smoothing) + 0.5 * smoothing
    loss = jnp.maximum(x, 0.0) - x * t + jnp.log1p(jnp.exp(-jnp.abs(x)))
    return jnp.mean(loss)


if __name__ == "__main__":
    key = jax.random.PRNGKey(0)
    k = jax.random.split(key, 8)

    # 1) small conv-head shape, n = 2*4*16*16 = 2048 (128-aligned, multi-tile)
    pred_a = jax.random.normal(k[0], (2, 4, 16, 16), dtype=jnp.float32)
    tgt_a = (jax.random.uniform(k[1], (2, 4, 16, 16)) > 0.5).astype(jnp.float32)
    out_a = jax.block_until_ready(label_smoothing_bce_with_logits(pred_a, tgt_a, 0.1))
    ref_a = _reference(pred_a, tgt_a, 0.1)
    assert jnp.allclose(out_a, ref_a, rtol=1e-5, atol=1e-6), (out_a, ref_a)

    # 2) non-128-aligned n = 3*5*37 = 555: masked kernel rows + 43-elem jnp tail
    pred_b = jax.random.normal(k[2], (3, 5, 37), dtype=jnp.float32)
    tgt_b = (jax.random.uniform(k[3], (3, 5, 37)) > 0.5).astype(jnp.float32)
    out_b = jax.block_until_ready(label_smoothing_bce_with_logits(pred_b, tgt_b, 0.1))
    ref_b = _reference(pred_b, tgt_b, 0.1)
    assert jnp.allclose(out_b, ref_b, rtol=1e-5, atol=1e-6), (out_b, ref_b)

    # 3) narrow-dtype streams pass straight through (bf16 logits, f32 targets)
    pred_c = jax.random.normal(k[4], (2, 4, 16, 16), dtype=jnp.bfloat16)
    tgt_c = (jax.random.uniform(k[5], (2, 4, 16, 16)) > 0.5).astype(jnp.float32)
    out_c = jax.block_until_ready(label_smoothing_bce_with_logits(pred_c, tgt_c, 0.1))
    ref_c = _reference(pred_c, tgt_c, 0.1)
    assert jnp.allclose(out_c, ref_c, rtol=1e-4, atol=1e-5), (out_c, ref_c)

    # 4) tiny classifier head (batch=2, out=4): n < 128 -> pure jnp tail path
    pred_d = jax.random.normal(k[6], (2, 4), dtype=jnp.float32)
    tgt_d = (jax.random.uniform(k[7], (2, 4)) > 0.5).astype(jnp.float32)
    out_d = jax.block_until_ready(label_smoothing_bce_with_logits(pred_d, tgt_d, 0.1))
    ref_d = _reference(pred_d, tgt_d, 0.1)
    assert jnp.allclose(out_d, ref_d, rtol=1e-5, atol=1e-6), (out_d, ref_d)

    print("KERNEL_OK")
</pallas_src>

<mosaic_0001>
module attributes {stable_mosaic.version = 11 : i64} {
  func.func @_bce_ls_kernel(%arg0: i32, %arg1: i32, %arg2: memref<8x128xf32, #tpu.memory_space<vmem>>, %arg3: memref<8x128xf32, #tpu.memory_space<vmem>>, %arg4: memref<8x128xf32, #tpu.memory_space<vmem>>) attributes {dimension_semantics = [#tpu.dimension_semantics<arbitrary>, #tpu.dimension_semantics<arbitrary>], iteration_bounds = array<i64: 1, 2>, scalar_prefetch = 0 : i64, scratch_operands = 0 : i64, tpu.core_type = #tpu.core_type<tc>, window_params = [{transform_indices = @transform_0, window_bounds = array<i64: 8, 128>}, {transform_indices = @transform_1, window_bounds = array<i64: 8, 128>}, {transform_indices = @transform_2, window_bounds = array<i64: 8, 128>}]} {
    %c2_i32 = arith.constant 2 : i32
    %0 = arith.muli %arg0, %c2_i32 : i32
    %1 = arith.addi %0, %arg1 : i32
    %c8_i32 = arith.constant 8 : i32
    %2 = arith.muli %1, %c8_i32 : i32
    %c0_i32 = arith.constant 0 : i32
    %3 = arith.cmpi eq, %arg1, %c0_i32 : i32
    %4 = arith.extui %3 : i1 to i32
    %c0_i32_0 = arith.constant 0 : i32
    %5 = arith.cmpi ne, %4, %c0_i32_0 : i32
    scf.if %5 {
      %cst_7 = arith.constant 0.000000e+00 : f32
      %13 = vector.broadcast %cst_7 : f32 to vector<8x128xf32>
      %c0 = arith.constant 0 : index
      %c0_8 = arith.constant 0 : index
      %14 = vector.load %arg4[%c0, %c0_8] : memref<8x128xf32, #tpu.memory_space<vmem>>, vector<8x128xf32>
      tpu.vector_store %arg4[%c0, %c0_8], %13 {strides = array<i32>} : memref<8x128xf32, #tpu.memory_space<vmem>>, vector<8x128xf32>,
    } else {
    }
    %c8_i32_1 = arith.constant 8 : i32
    %6 = arith.addi %2, %c8_i32_1 : i32
    %c16_i32 = arith.constant 16 : i32
    %7 = arith.cmpi sle, %6, %c16_i32 : i32
    %8 = arith.extui %7 : i1 to i32
    %cst = arith.constant 0.899999976 : f32
    %cst_2 = arith.constant 5.000000e-02 : f32
    %c0_i32_3 = arith.constant 0 : i32
    %9 = arith.cmpi ne, %8, %c0_i32_3 : i32
    scf.if %9 {
      %c0 = arith.constant 0 : index
      %c0_7 = arith.constant 0 : index
      %13 = vector.load %arg4[%c0, %c0_7] : memref<8x128xf32, #tpu.memory_space<vmem>>, vector<8x128xf32>
      %cst_8 = arith.constant 0.000000e+00 : f32
      %14 = vector.broadcast %cst_8 : f32 to vector<8x128xf32>
      %c0_i32_9 = arith.constant 0 : i32
      %c8_i32_10 = arith.constant 8 : i32
      %15 = arith.muli %c0_i32_9, %c8_i32_10 : i32
      %16 = tpu.assume_multiple %15, 8 : i32
      %17 = arith.index_cast %16 : i32 to index
      %c0_11 = arith.constant 0 : index
      %18 = vector.load %arg2[%17, %c0_11] : memref<8x128xf32, #tpu.memory_space<vmem>>, vector<8x128xf32>
      %19 = arith.index_cast %16 : i32 to index
      %c0_12 = arith.constant 0 : index
      %20 = vector.load %arg3[%19, %c0_12] : memref<8x128xf32, #tpu.memory_space<vmem>>, vector<8x128xf32>
      %21 = vector.broadcast %cst : f32 to vector<8x128xf32>
      %22 = arith.mulf %20, %21 : vector<8x128xf32>
      %23 = vector.broadcast %cst_2 : f32 to vector<8x128xf32>
      %24 = arith.addf %22, %23 : vector<8x128xf32>
      %cst_13 = arith.constant 0.000000e+00 : f32
      %25 = vector.broadcast %cst_13 : f32 to vector<8x128xf32>
      %26 = arith.maximumf %18, %25 : vector<8x128xf32>
      %27 = arith.mulf %18, %24 : vector<8x128xf32>
      %28 = arith.subf %26, %27 : vector<8x128xf32>
      %29 = math.absf %18 : vector<8x128xf32>
      %cst_14 = arith.constant 0.000000e+00 : f32
      %30 = vector.broadcast %cst_14 : f32 to vector<8x128xf32>
      %31 = arith.subf %30, %29 : vector<8x128xf32>
      %32 = math.exp %31 : vector<8x128xf32>
      %cst_15 = arith.constant 1.000000e+00 : f32
      %33 = vector.broadcast %cst_15 : f32 to vector<8x128xf32>
      %34 = arith.addf %33, %32 : vector<8x128xf32>
      %35 = math.log %34 : vector<8x128xf32>
      %36 = arith.addf %28, %35 : vector<8x128xf32>
      %37 = vector.shape_cast %36 : vector<8x128xf32> to vector<1x8x128xf32>
      %cst_16 = arith.constant dense<0.000000e+00> : vector<8x128xf32>
      %38 = vector.multi_reduction <add>, %37, %cst_16 [0] : vector<1x8x128xf32> to vector<8x128xf32>
      %39 = arith.addf %14, %38 : vector<8x128xf32>
      %c1_i32 = arith.constant 1 : i32
      %40 = arith.addf %13, %39 : vector<8x128xf32>
      %c0_17 = arith.constant 0 : index
      %c0_18 = arith.constant 0 : index
      %41 = vector.load %arg4[%c0_17, %c0_18] : memref<8x128xf32, #tpu.memory_space<vmem>>, vector<8x128xf32>
      tpu.vector_store %arg4[%c0_17, %c0_18], %40 {strides = array<i32>} : memref<8x128xf32, #tpu.memory_space<vmem>>, vector<8x128xf32>,
    } else {
    }
    %true = arith.constant true
    %10 = arith.xori %7, %true : i1
    %11 = arith.extui %10 : i1 to i32
    %cst_4 = arith.constant 0.899999976 : f32
    %cst_5 = arith.constant 5.000000e-02 : f32
    %c0_i32_6 = arith.constant 0 : i32
    %12 = arith.cmpi ne, %11, %c0_i32_6 : i32
    scf.if %12 {
      %c0 = arith.constant 0 : index
      %c0_7 = arith.constant 0 : index
      %13 = vector.load %arg4[%c0, %c0_7] : memref<8x128xf32, #tpu.memory_space<vmem>>, vector<8x128xf32>
      %cst_8 = arith.constant 0.000000e+00 : f32
      %14 = vector.broadcast %cst_8 : f32 to vector<8x128xf32>
      %c0_i32_9 = arith.constant 0 : i32
      %c8_i32_10 = arith.constant 8 : i32
      %15 = arith.muli %c0_i32_9, %c8_i32_10 : i32
      %16 = tpu.assume_multiple %15, 8 : i32
      %17 = arith.index_cast %16 : i32 to index
      %c0_11 = arith.constant 0 : index
      %18 = vector.load %arg2[%17, %c0_11] : memref<8x128xf32, #tpu.memory_space<vmem>>, vector<8x128xf32>
      %19 = arith.index_cast %16 : i32 to index
      %c0_12 = arith.constant 0 : index
      %20 = vector.load %arg3[%19, %c0_12] : memref<8x128xf32, #tpu.memory_space<vmem>>, vector<8x128xf32>
      %21 = vector.broadcast %cst_4 : f32 to vector<8x128xf32>
      %22 = arith.mulf %20, %21 : vector<8x128xf32>
      %23 = vector.broadcast %cst_5 : f32 to vector<8x128xf32>
      %24 = arith.addf %22, %23 : vector<8x128xf32>
      %cst_13 = arith.constant 0.000000e+00 : f32
      %25 = vector.broadcast %cst_13 : f32 to vector<8x128xf32>
      %26 = arith.maximumf %18, %25 : vector<8x128xf32>
      %27 = arith.mulf %18, %24 : vector<8x128xf32>
      %28 = arith.subf %26, %27 : vector<8x128xf32>
      %29 = math.absf %18 : vector<8x128xf32>
      %cst_14 = arith.constant 0.000000e+00 : f32
      %30 = vector.broadcast %cst_14 : f32 to vector<8x128xf32>
      %31 = arith.subf %30, %29 : vector<8x128xf32>
      %32 = math.exp %31 : vector<8x128xf32>
      %cst_15 = arith.constant 1.000000e+00 : f32
      %33 = vector.broadcast %cst_15 : f32 to vector<8x128xf32>
      %34 = arith.addf %33, %32 : vector<8x128xf32>
      %35 = math.log %34 : vector<8x128xf32>
      %36 = arith.addf %28, %35 : vector<8x128xf32>
      %c8_i32_16 = arith.constant 8 : i32
      %37 = arith.muli %c0_i32_9, %c8_i32_16 : i32
      %38 = arith.addi %2, %37 : i32
      %39 = tpu.iota {dimensions = array<i32: 0>} : vector<8x128xi32>
      %40 = vector.broadcast %38 : i32 to vector<8x128xi32>
      %41 = arith.addi %40, %39 : vector<8x128xi32>
      %c16_i32_17 = arith.constant 16 : i32
      %42 = vector.broadcast %c16_i32_17 : i32 to vector<8x128xi32>
      %43 = arith.cmpi slt, %41, %42 : vector<8x128xi32>
      %cst_18 = arith.constant 0.000000e+00 : f32
      %44 = vector.broadcast %cst_18 : f32 to vector<8x128xf32>
      %45 = arith.select %43, %36, %44 : vector<8x128xi1>, vector<8x128xf32>
      %46 = vector.shape_cast %45 : vector<8x128xf32> to vector<1x8x128xf32>
      %cst_19 = arith.constant dense<0.000000e+00> : vector<8x128xf32>
      %47 = vector.multi_reduction <add>, %46, %cst_19 [0] : vector<1x8x128xf32> to vector<8x128xf32>
      %48 = arith.addf %14, %47 : vector<8x128xf32>
      %c1_i32 = arith.constant 1 : i32
      %49 = arith.addf %13, %48 : vector<8x128xf32>
      %c0_20 = arith.constant 0 : index
      %c0_21 = arith.constant 0 : index
      %50 = vector.load %arg4[%c0_20, %c0_21] : memref<8x128xf32, #tpu.memory_space<vmem>>, vector<8x128xf32>
      tpu.vector_store %arg4[%c0_20, %c0_21], %49 {strides = array<i32>} : memref<8x128xf32, #tpu.memory_space<vmem>>, vector<8x128xf32>,
    } else {
    }
    return
  }
  func.func @transform_0(%arg0: i32, %arg1: i32) -> (i32, i32) {
    %c2_i32 = arith.constant 2 : i32
    %0 = arith.muli %arg0, %c2_i32 : i32
    %1 = arith.addi %0, %arg1 : i32
    %c0_i32 = arith.constant 0 : i32
    %c0_i32_0 = arith.constant 0 : i32
    return %1, %c0_i32 : i32, i32
  }
  func.func @transform_1(%arg0: i32, %arg1: i32) -> (i32, i32) {
    %c2_i32 = arith.constant 2 : i32
    %0 = arith.muli %arg0, %c2_i32 : i32
    %1 = arith.addi %0, %arg1 : i32
    %c0_i32 = arith.constant 0 : i32
    %c0_i32_0 = arith.constant 0 : i32
    return %1, %c0_i32 : i32, i32
  }
  func.func @transform_2(%arg0: i32, %arg1: i32) -> (i32, i32) {
    %c0_i32 = arith.constant 0 : i32
    %c0_i32_0 = arith.constant 0 : i32
    return %arg0, %c0_i32 : i32, i32
  }
}

</mosaic_0001>

<bundles_post_ra>
// kernel: tpu_custom_call.1
= control target key start
LH: loop header
LB: loop body
LE: loop exit
PB: predicated region body
PF: predicated region fallthrough
CT: control target
= control target key end

     0   :  { %7 = vsyncpa [#allocation3], 0  ;;  %s752_s0 = inlined_call_operand.hbm [shape: f32[16,128], index: 0, kind: input, shape index: {}]   ;;  %s753_s1 = inlined_call_operand.hbm [shape: f32[16,128], index: 1, kind: input, shape index: {}]   ;;  %s754_s2 = inlined_call_operand.hbm [shape: f32[8,128], index: 2, kind: output, shape index: {}]  }
   0x1   :  { %9 = vsyncpa [#allocation3 + $0x1], 0 }
   0x2   :  { %10 = vsyncpa [#allocation6], 0 }
   0x3   :  { %12 = vsyncpa [#allocation6 + $0x1], 0 }
   0x4   :  { %13 = vsyncpa [#allocation4], 0  ;;  %s640_s9 = smov 0   ;;  %s642_s10 = smov 0  }
   0x5   :  { %s644_s11 = smov 0   ;;  %s646_s12 = smov 0  }
   0x6   :  { %s648_s13 = smov 0   ;;  %s650_s14 = smov 0  }
   0x7 LB: > { %s382_s15 = sadd.s32 4294967295, %s621_s14   ;;  %s28_s16 = sadd.s32 1, %s617_s13  ;;  %s621_s14 = sphi %s650_s14, %s19_s14   ;;  %s617_s13 = sphi %s648_s13, %s761_s13   ;;  %s613_s12 = sphi %s646_s12, %s760_s12   ;;  %s609_s11 = sphi %s644_s11, %s759_s11   ;;  %s605_s10 = sphi %s642_s10, %s758_s10   ;;  %s601_s9 = sphi %s640_s9, %s757_s9  }
   0x8   : > { %p29_p0 = scmp.ge.s32.totalorder %s28_s16, 2  ;;  %s42_s17 = sadd.s32 1, %s609_s11 }
   0x9   : > { %p49_p1 = scmp.ne.s32.totalorder %s609_s11, %s605_s10  ;;  %p50_p2 = scmp.eq.s32.totalorder %s621_s14, 0 }
   0xa   : > { %s763_s16 = smov (%p29_p0, %s28_s16), 0  ;;  %p55_p4 = scmp.ne.s32.totalorder %s605_s10, %s601_s9 }
   0xb   : > { %p676_p3 = por %p50_p2, %p49_p1  ;;  %s39_s19 = ssub.s32 %s617_s13, %s763_s16 }
   0xc   : > { %p56_p5 = scmp.eq.s32.totalorder %s382_s15, 0  ;;  %p40_p6 = scmp.eq.s32.totalorder %s39_s19, 0 }
   0xd   : > { %p414_p8 = scmp.lt.s32.totalorder %s621_s14, 2  ;;  %s135_s22 = sand.u32 1, %s609_s11  }
   0xe   : > { %p685_p7 = por %p56_p5, %p55_p4  ;;  %s386_s23 = sshll.u32 %s617_s13, 3 }
   0xf   : > { %s691_s21 = scalar_select %p40_p6, %s609_s11, %s42_s17  }
  0x10   : > { %s385_s24 = sshll.u32 %s135_s22, 3  ;;  %s145_s27 = scalar_lea.hbm %s752_s0, %s386_s23 }
  0x11   : > { %s147_s28 = sshll.u32 %s145_s27, 4  ;;  %s139_s29 = scalar_lea.vmem [#allocation2], %s385_s24  ;;  %s148_s28 = int_to_ptr.hbm [resolvable:$true] %s147_s28 }
  0x12   : > { %s149_s30 = sshll.u32 %s139_s29, 4  ;;  %p408_p9 = pnand %p414_p8, %p676_p3  ;;  %s150_s30 = int_to_ptr.vmem [resolvable:$true] %s149_s30 }
  0x13   : > { %p389_p10 = scmp.ge.s32.totalorder %s621_s14, 1  ;;  %p175_p11 = scmp.lt.s32.totalorder %s621_s14, 3 }
  0x14   : > { %s136_s3 = scalar_lea.sflag [#allocation3], %s135_s22  ;;  %s166_s6 = scalar_lea.hbm %s753_s1, %s386_s23 }
  0x15   : > { %410 = dma.hbm_to_vmem [thread:$0]  (!%p408_p9), %s148_s28, 128, %s150_s30, %s136_s3  }
  0x16   : > { %p176_p12 = pnand %p389_p10, %p175_p11  ;;  %s168_s7 = sshll.u32 %s166_s6, 4  ;;  %s169_s7 = int_to_ptr.hbm [resolvable:$true] %s168_s7 }
  0x17   : > { %s160_s8 = scalar_lea.vmem [#allocation5], %s385_s24  ;;  %s157_s17 = scalar_lea.sflag [#allocation6], %s135_s22 }
  0x18   : > { %s170_s9 = sshll.u32 %s160_s8, 4  ;;  %179 = sbr.rel (%p176_p12) target bundleno = 121 (0x79), region = 28  ;;  %s171_s9 = int_to_ptr.vmem [resolvable:$true] %s170_s9 }
  0x19   : > { %413 = dma.hbm_to_vmem [thread:$0]  (!%p408_p9), %s169_s7, 128, %s171_s9, %s157_s17  }
  0x1a   : > { %s181_s18 = sand.u32 (!%p176_p12), 1, %s605_s10  }
  0x1b   : > { %s390_s19 = sshll.u32 (!%p176_p12), %s181_s18, 3  ;;  %s182_s25 = scalar_lea.sflag (!%p176_p12), [#allocation3], %s181_s18 }
  0x1c   : > { %s706_s26 = scalar_lea.vmem (!%p176_p12), [#allocation2], %s390_s19 }
  0x1d   : > { %588 = dma.done.wait (%p685_p7), %s182_s25, 128  }
  0x1e   : > { %590 = vsyncadd (%p685_p7), %s182_s25, 4294967168  ;;  %s192_s23 = scalar_lea.sflag [#allocation6], %s181_s18  ;;  %s712_s24 = scalar_lea.vmem [#allocation5], %s390_s19 }
  0x1f   : > { %592 = dma.done.wait (%p685_p7), %s192_s23, 128  }
  0x20   : > { %594 = vsyncadd (%p685_p7), %s192_s23, 4294967168  ;;  %s392_s22 = sshll.u32 %s613_s12, 3  ;;  %p393_p13 = scmp.ne.s32.totalorder %s613_s12, 0 }
  0x22   : > { %227 = sbr.rel (%p393_p13) target bundleno = 41 (0x29), region = 40 }
  0x27   : > { %v623_v0 = vmov 0.0  }
  0x28   : > { %228 = vst [vmem:[#allocation7] sm:$0xff] %v623_v0 }
  0x29 PF: > { %s229_s27 = sadd.s32 8, %s392_s22 }
  0x2a   : > { %p230_p0 = scmp.le.s32.totalorder %s229_s27, 16  ;;  %p394_p1 = scmp.gt.s32.totalorder %s229_s27, 16 }
  0x2c   : > { %233 = sbr.rel (%p394_p1) target bundleno = 79 (0x4f), region = 44 }
  0x31   : > { %v235_v1 = vld [vmem:[%s706_s26] sm:$0xff]  ;;  %v236_v5 = vld [vmem:[%s712_s24] sm:$0xff] }
  0x32   : > { %v242_v2 = vand.u32 2147483647, %v235_v1  ;;  %v237_v6 = vmul.f32 0.9, %v236_v5  ;;  %v239_v10 = vmax.f32 %v235_v1, 0.0  ;;  %v234_v15 = vld [vmem:[#allocation7] sm:$0xff] }
  0x34   : > { %v243_v3 = vsub.f32 0.0, %v242_v2  ;;  %v238_v8 = vadd.f32 0.05, %v237_v6 }
  0x36   : > { %v244_v4 = vmul.f32 1.442695, %v243_v3  ;;  %v240_v11 = vmul.f32 %v238_v8, %v235_v1 }
  0x38   : > { %467 = vpow2.f32 %v244_v4  ;;  %v241_v12 = vsub.f32 %v239_v10, %v240_v11 }
  0x3e   : > { %v468_v7 = vpop.eup %467 }
  0x3f   : > { %v246_v9 = vadd.f32 1.0, %v468_v7 }
  0x41   : > { %469 = vlog2.f32 %v246_v9 }
  0x47   : > { %v470_v13 = vpop.eup %469 }
  0x48   : > { %v248_v14 = vmul.f32 0.6931472, %v470_v13 }
  0x4a   : > { %v249_v16 = vadd.f32 %v248_v14, %v241_v12 }
  0x4c   : > { %v252_v17 = vadd.f32 %v249_v16, %v234_v15 }
  0x4e   : > { %253 = vst [vmem:[#allocation7] sm:$0xff] %v252_v17 }
  0x4f PF: > { %256 = sbr.rel (%p230_p0) target bundleno = 115 (0x73), region = 48 }
  0x54   : > { %v258_v18 = vld [vmem:[%s706_s26] sm:$0xff]  ;;  %v259_v22 = vld [vmem:[%s712_s24] sm:$0xff]  ;;  %v273_v24 = vlaneseq  ;;  %v275_v31 = vstv %s392_s22 }
  0x55   : > { %v265_v19 = vand.u32 2147483647, %v258_v18  ;;  %v260_v23 = vmul.f32 0.9, %v259_v22  ;;  %v262_v29 = vmax.f32 %v258_v18, 0.0  ;;  %v257_v36 = vld [vmem:[#allocation7] sm:$0xff] }
  0x56   : > { %v274_v28 = vshrl.u32 %v273_v24, 7 }
  0x57   : > { %v266_v20 = vsub.f32 0.0, %v265_v19  ;;  %v261_v26 = vadd.f32 0.05, %v260_v23 }
  0x58   : > { %v276_v32 = vadd.s32 %v275_v31, %v274_v28 }
  0x59   : > { %v267_v21 = vmul.f32 1.442695, %v266_v20  ;;  %v263_v30 = vmul.f32 %v261_v26, %v258_v18 }
  0x5a   : > { %vm277_vm0 = vcmp.lt.s32.totalorder %v276_v32, 16 }
  0x5b   : > { %471 = vpow2.f32 %v267_v21  ;;  %v264_v33 = vsub.f32 %v262_v29, %v263_v30 }
  0x61   : > { %v472_v25 = vpop.eup %471 }
  0x62   : > { %v269_v27 = vadd.f32 1.0, %v472_v25 }
  0x64   : > { %473 = vlog2.f32 %v269_v27 }
  0x6a   : > { %v474_v34 = vpop.eup %473 }
  0x6b   : > { %v271_v35 = vmul.f32 0.6931472, %v474_v34 }
  0x6d   : > { %v272_v37 = vadd.f32 %v271_v35, %v264_v33 }
  0x6f   : > { %v278_v38 = vsel %vm277_vm0, %v272_v37, 0.0 }
  0x70   : > { %v281_v39 = vadd.f32 %v278_v38, %v257_v36 }
  0x72   : > { %282 = vst [vmem:[#allocation7] sm:$0xff] %v281_v39 }
  0x73 PF: > { %p415_p2 = scmp.eq.s32.totalorder %s382_s15, 1  ;;  %s293_s29 = sshll.u32 %s754_s2, 4  ;;  %s294_s29 = int_to_ptr.hbm [resolvable:$true] %s293_s29 }
  0x74   : > { %s624_s12 = smov [#allocation7]  }
  0x75   : > { %s291_s30 = sshll.u32 %s624_s12, 4  ;;  %s292_s30 = int_to_ptr.vmem [resolvable:$true] %s291_s30 }
  0x76   : > { %404 = dma.vmem_to_hbm [thread:$0]  (%p415_p2), %s292_s30, 128, %s294_s29, [#allocation4]  }
  0x77   : > { %596 = dma.done.wait (%p415_p2), [#allocation4], 128  }
  0x78   : > { %598 = vsyncadd (%p415_p2), [#allocation4], 4294967168 }
  0x79 PF: > { %s19_s14 = sadd.s32 1, %s621_s14   ;;  %s757_s9 = smov %s605_s10 }
  0x7a   : > { %p16_p3 = scmp.ge.s32.totalorder %s19_s14, 4   ;;  %s758_s10 = smov %s609_s11 }
  0x7b   : > { %s759_s11 = smov %s691_s21  ;;  %s760_s12 = smov %s617_s13 }
  0x7c   : > { %s761_s13 = smov %s763_s16  ;;  %18 = sbr.rel (!%p16_p3) target bundleno = 7 (0x7), region = 91 }
  0x81   :  { %307 = vsyncpa [#allocation3], 1 }
  0x82   :  { %309 = vsyncpa [#allocation3 + $0x1], 1 }
  0x83   :  { %310 = vsyncpa [#allocation6], 1 }
  0x84   :  { %312 = vsyncpa [#allocation6 + $0x1], 1 }
  0x85   :  { %313 = vsyncpa [#allocation4], 1 }
  0x86   :  { %315 = vsyncpa [#allocation4 + $0x1], 1 }

</bundles_post_ra>
